<compile_context>
chip_gen: v5e
topology: v5e:2x2
jax: 0.10.0
libtpu: 0.0.40
codegen_flags: <defaults>
</compile_context>

<pallas_src>
import jax
import jax.numpy as jnp
from jax.experimental import pallas as pl
from jax.experimental.pallas import tpu as pltpu

B, CIN, H, W = 2, 4, 16, 16
COUT, KH, KW = 8, 3, 3
NCLS = 10
NCLS_PAD = 16                 # sublane-padded logits rows (clean unmasked stores)
HW = H * W                    # 256 spatial positions per image
N = B * HW                    # 512 -> lane axis of the conv activations
KKC = CIN * KH * KW           # 36  -> conv contraction dim
KKC_PAD = 40                  # rounded up to a multiple of 8 sublanes (row 36 = bias)
LANE = 128                    # lane-padded width of the (tiny) logits output


def _fused_forward_kernel(patches_ref, w1t_ref, w2_ref, b2_ref, p_ref, out_ref):
    # Conv (+ baked-in bias) as one lane-dense bf16 MXU matmul with f32 accumulation:
    #   (COUT, 40)bf16 @ (40, 512)bf16 -> (COUT, 512) f32
    conv = jnp.dot(w1t_ref[...], patches_ref[...],
                   preferred_element_type=jnp.float32)
    act = jnp.maximum(conv, 0.0)                            # ReLU (f32 VPU)

    # Global average pool as an MXU matmul against the constant pooling matrix:
    #   (COUT, 512) @ (512, 128) -> (COUT, 128); column b holds mean over batch b.
    pooled = jnp.dot(act, p_ref[...], preferred_element_type=jnp.float32)

    # FC: (16, COUT) @ (COUT, 128) -> (16, 128); rows >= NCLS and cols >= B are junk.
    logits = jnp.dot(w2_ref[...], pooled, preferred_element_type=jnp.float32)
    out_ref[...] = logits + b2_ref[...]


def pack_params(conv_w, conv_b, fc_w, fc_b):
    """One-time weight packing (hoisted out of the per-call forward path)."""
    # Conv weights: (COUT, CIN, KH, KW) -> (COUT, 40) with bias baked into col 36.
    w1t = conv_w.reshape(COUT, KKC)
    w1t = jnp.pad(w1t, ((0, 0), (0, KKC_PAD - KKC)))
    w1t = w1t.at[:, KKC].set(conv_b)
    w1t = w1t.astype(jnp.bfloat16)                          # MXU-native operands

    # FC weights/bias padded to 16 sublane rows.
    w2 = jnp.pad(fc_w, ((0, NCLS_PAD - NCLS), (0, 0)))      # (16, COUT) f32
    b2 = jnp.pad(fc_b, (0, NCLS_PAD - NCLS)).reshape(NCLS_PAD, 1)  # (16, 1) f32

    # Constant pooling matrix: P[b*HW + s, b] = 1/HW, zero elsewhere.
    rows = jnp.arange(N)[:, None] // HW                     # (512, 1) -> batch index
    cols = jnp.arange(LANE)[None, :]                        # (1, 128)
    pool = jnp.where(rows == cols, 1.0 / float(HW), 0.0).astype(jnp.float32)  # (512,128)
    return w1t, w2, b2, pool


@jax.jit
def forward(x, w1t, w2, b2, pool):
    """x: (B, CIN, H, W) float32 NCHW -> logits (B, NCLS), matching the PyTorch net."""
    # ---- im2col (the only remaining wrapper-side data prep) -----------------
    xp = jnp.pad(x, ((0, 0), (0, 0), (1, 1), (1, 1)))       # pad=1 zero border
    taps = [xp[:, :, ky:ky + H, kx:kx + W]                  # 9 shifted (B,CIN,H,W) views
            for ky in range(KH) for kx in range(KW)]
    stk = jnp.stack(taps, axis=0)                           # (9, B, CIN, H, W)
    # contraction index = ci*9 + (ky*3 + kx); lane index = b*HW + y*W + x
    patches = jnp.transpose(stk, (2, 0, 1, 3, 4)).reshape(KKC, N)        # (36, 512)
    ones_row = jnp.ones((1, N), patches.dtype)              # multiplies the baked bias
    zero_pad = jnp.zeros((KKC_PAD - KKC - 1, N), patches.dtype)
    patches = jnp.concatenate([patches, ones_row, zero_pad], axis=0)     # (40, 512)
    patches = patches.astype(jnp.bfloat16)

    vmem = pl.BlockSpec(memory_space=pltpu.MemorySpace.VMEM)
    out_wide = pl.pallas_call(
        _fused_forward_kernel,
        out_shape=jax.ShapeDtypeStruct((NCLS_PAD, LANE), jnp.float32),
        in_specs=[vmem, vmem, vmem, vmem, vmem],
        out_specs=vmem,
        compiler_params=pltpu.CompilerParams(vmem_limit_bytes=4 * 1024 * 1024),
    )(patches, w1t, w2, b2, pool)

    return out_wide[:NCLS, :B].T                            # (B, NCLS)


def reference_forward(x, conv_w, conv_b, fc_w, fc_b):
    """Pure-JAX reference with PyTorch semantics: conv(pad=1) -> ReLU -> GAP -> FC."""
    out = jax.lax.conv_general_dilated(
        x, conv_w, window_strides=(1, 1), padding=((1, 1), (1, 1)),
        dimension_numbers=("NCHW", "OIHW", "NCHW"))
    out = jnp.maximum(out + conv_b[None, :, None, None], 0.0)
    pooled = jnp.mean(out, axis=(2, 3))                     # (B, COUT)
    return pooled @ fc_w.T + fc_b[None, :]                  # (B, NCLS)


if __name__ == "__main__":
    key = jax.random.PRNGKey(0)
    kx, kw1, kb1, kw2, kb2 = jax.random.split(key, 5)
    x = jax.random.normal(kx, (B, CIN, H, W), dtype=jnp.float32)
    conv_w = 0.3 * jax.random.normal(kw1, (COUT, CIN, KH, KW), dtype=jnp.float32)
    conv_b = 0.1 * jax.random.normal(kb1, (COUT,), dtype=jnp.float32)
    fc_w = 0.5 * jax.random.normal(kw2, (NCLS, COUT), dtype=jnp.float32)
    fc_b = 0.1 * jax.random.normal(kb2, (NCLS,), dtype=jnp.float32)

    # One-time parameter packing (not part of the per-call forward path).
    w1t, w2, b2, pool = jax.block_until_ready(pack_params(conv_w, conv_b, fc_w, fc_b))

    out = jax.block_until_ready(forward(x, w1t, w2, b2, pool))
    ref = jax.block_until_ready(reference_forward(x, conv_w, conv_b, fc_w, fc_b))

    assert out.shape == (B, NCLS), out.shape
    max_err = float(jnp.max(jnp.abs(out - ref)))
    assert max_err < 2e-2, f"kernel/reference mismatch: max abs err = {max_err}"
    print("KERNEL_OK")
</pallas_src>

<mosaic_0001>
module attributes {stable_mosaic.version = 11 : i64} {
  func.func @_fused_forward_kernel(%arg0: memref<40x512xbf16, #tpu.memory_space<vmem>>, %arg1: memref<8x40xbf16, #tpu.memory_space<vmem>>, %arg2: memref<16x8xf32, #tpu.memory_space<vmem>>, %arg3: memref<16x1xf32, #tpu.memory_space<vmem>>, %arg4: memref<512x128xf32, #tpu.memory_space<vmem>>, %arg5: memref<16x128xf32, #tpu.memory_space<vmem>>) attributes {dimension_semantics = [], scalar_prefetch = 0 : i64, scratch_operands = 0 : i64, tpu.core_type = #tpu.core_type<tc>} {
    %c0 = arith.constant 0 : index
    %c0_0 = arith.constant 0 : index
    %0 = vector.load %arg1[%c0, %c0_0] : memref<8x40xbf16, #tpu.memory_space<vmem>>, vector<8x40xbf16>
    %c0_1 = arith.constant 0 : index
    %c0_2 = arith.constant 0 : index
    %1 = vector.load %arg0[%c0_1, %c0_2] : memref<40x512xbf16, #tpu.memory_space<vmem>>, vector<40x512xbf16>
    %cst = arith.constant dense<0.000000e+00> : vector<8x512xf32>
    %2 = tpu.matmul %0, %1, %cst {dimension_numbers = #tpu.dot_dimension_numbers<[1], [0], [0], [1], [0, 0, 1, 1], [], []>} : vector<8x40xbf16>, vector<40x512xbf16>, vector<8x512xf32> -> vector<8x512xf32>
    %cst_3 = arith.constant 0.000000e+00 : f32
    %3 = vector.broadcast %cst_3 : f32 to vector<8x512xf32>
    %4 = arith.maximumf %2, %3 : vector<8x512xf32>
    %c0_4 = arith.constant 0 : index
    %c0_5 = arith.constant 0 : index
    %5 = vector.load %arg4[%c0_4, %c0_5] : memref<512x128xf32, #tpu.memory_space<vmem>>, vector<512x128xf32>
    %cst_6 = arith.constant dense<0.000000e+00> : vector<8x128xf32>
    %6 = tpu.matmul %4, %5, %cst_6 {dimension_numbers = #tpu.dot_dimension_numbers<[1], [0], [0], [1], [0, 0, 1, 1], [], []>} : vector<8x512xf32>, vector<512x128xf32>, vector<8x128xf32> -> vector<8x128xf32>
    %c0_7 = arith.constant 0 : index
    %c0_8 = arith.constant 0 : index
    %7 = vector.load %arg2[%c0_7, %c0_8] : memref<16x8xf32, #tpu.memory_space<vmem>>, vector<16x8xf32>
    %cst_9 = arith.constant dense<0.000000e+00> : vector<16x128xf32>
    %8 = tpu.matmul %7, %6, %cst_9 {dimension_numbers = #tpu.dot_dimension_numbers<[1], [0], [0], [1], [0, 0, 1, 1], [], []>} : vector<16x8xf32>, vector<8x128xf32>, vector<16x128xf32> -> vector<16x128xf32>
    %c0_10 = arith.constant 0 : index
    %c0_11 = arith.constant 0 : index
    %9 = vector.load %arg3[%c0_10, %c0_11] : memref<16x1xf32, #tpu.memory_space<vmem>>, vector<16x1xf32>
    %10 = vector.broadcast %9 : vector<16x1xf32> to vector<16x128xf32>
    %11 = arith.addf %8, %10 : vector<16x128xf32>
    %c0_12 = arith.constant 0 : index
    %c0_13 = arith.constant 0 : index
    %12 = vector.load %arg5[%c0_12, %c0_13] : memref<16x128xf32, #tpu.memory_space<vmem>>, vector<16x128xf32>
    tpu.vector_store %arg5[%c0_12, %c0_13], %11 {strides = array<i32>} : memref<16x128xf32, #tpu.memory_space<vmem>>, vector<16x128xf32>,
    return
  }
}

</mosaic_0001>

<bundles_post_ra>
// kernel: forward.1
= control target key start
LH: loop header
LB: loop body
LE: loop exit
PB: predicated region body
PF: predicated region fallthrough
CT: control target
= control target key end

     0   :  { %vm86_vm0 = vcmask 1043456   ;;  %vm82_vm1 = vcmask 326656   ;;  %vm313_vm2 = vcmask 64512   ;;  %s700_s0 = inlined_call_operand.vmem [shape: bf16[40,512], index: 0, kind: input, shape index: {}]   ;;  %s701_s4 = inlined_call_operand.vmem [shape: f32[512,128], index: 4, kind: input, shape index: {}]   ;;  %s702_s1 = inlined_call_operand.vmem [shape: bf16[8,40], index: 1, kind: input, shape index: {}]   ;;  %s703_s3 = inlined_call_operand.vmem [shape: f32[16,1], index: 3, kind: input, shape index: {}]   ;;  %s704_s2 = inlined_call_operand.vmem [shape: f32[16,8], index: 2, kind: input, shape index: {}]   ;;  %s705_s5 = inlined_call_operand.vmem [shape: f32[16,128], index: 5, kind: output, shape index: {}]  }
   0x1   :  { %v31_v0 = vld [vmem:[%s700_s0 + $0x48] sm:$0xff]  ;;  %v30_v1 = vld [vmem:[%s700_s0 + $0x40] sm:$0xff]  ;;  %v394_v7 = vld [vmem:[%s700_s0 + $0x34] sm:$0xf0] }
   0x2   :  { %v60_v2 = vunpack.c.l.b16 %v31_v0  ;;  %v61_v3 = vunpack.c.h.b16 %v31_v0  ;;  %v58_v4 = vunpack.c.l.b16 %v30_v1  ;;  %v59_v5 = vunpack.c.h.b16 %v30_v1  ;;  %v375_v6 = vld [vmem:[%s700_s0 + $0x28] sm:$0xf]  ;;  %v392_v12 = vld [vmem:[%s700_s0 + $0x2c] sm:$0xf]  ;;  %v377_v13 = vld [vmem:[%s700_s0 + $0x38] sm:$0xf0] }
   0x3   :  { %v367_v14 = vld [vmem:[%s700_s0 + $0x20] sm:$0xf]  ;;  %v393_v15 = vld [vmem:[%s700_s0 + $0x2c] sm:$0xf0]  ;;  %v391_v16 = vld [vmem:[%s700_s0 + $0x24] sm:$0xf]  ;;  %v376_v22 = vor.u32 %v394_v7, %v375_v6  ;;  %v380_v23 = vor.u32 %v392_v12, %v377_v13 }
   0x4   :  { %v72_v8 = vpack.c.b16 %v60_v2, %v60_v2  ;;  %v73_v9 = vpack.c.b16 %v61_v3, %v61_v3  ;;  %v70_v10 = vpack.c.b16 %v58_v4, %v58_v4  ;;  %v71_v11 = vpack.c.b16 %v59_v5, %v59_v5  ;;  %v369_v17 = vld [vmem:[%s700_s0 + $0x30] sm:$0xf0]  ;;  %v359_v24 = vld [vmem:[%s700_s0 + $0x8] sm:$0xf]  ;;  %v390_v25 = vld [vmem:[%s700_s0 + $0x14] sm:$0xf0] }
   0x5   :  { %v368_v26 = vor.u32 %v393_v15, %v367_v14  ;;  %v372_v27 = vor.u32 %v391_v16, %v369_v17  ;;  %v388_v28 = vld [vmem:[%s700_s0 + $0xc] sm:$0xf]  ;;  %v361_v29 = vld [vmem:[%s700_s0 + $0x18] sm:$0xf0]  ;;  %v351_v30 = vld [vmem:[%s700_s0] sm:$0xf]  ;;  %v360_v34 = vor.u32 %v390_v25, %v359_v24 }
   0x6   :  { %v94_v18 = vsel %vm86_vm0, %v72_v8, 0  ;;  %v97_v19 = vsel %vm86_vm0, %v73_v9, 0  ;;  %v88_v20 = vsel %vm86_vm0, %v70_v10, 0  ;;  %v91_v21 = vsel %vm86_vm0, %v71_v11, 0  ;;  %v389_v31 = vld [vmem:[%s700_s0 + $0xc] sm:$0xf0] }
   0x7   :  { %130 = vmatpush.bf16.msra.mxu2 %v94_v18  ;;  %143 = vmatpush.bf16.msra.mxu3 %v97_v19  ;;  %v387_v32 = vld [vmem:[%s700_s0 + $0x4] sm:$0xf]  ;;  %v353_v33 = vld [vmem:[%s700_s0 + $0x10] sm:$0xf0]  ;;  %v364_v35 = vor.u32 %v388_v28, %v361_v29  ;;  %v352_v36 = vor.u32 %v389_v31, %v351_v30  ;;  %v202_v38 = vld [vmem:[%s701_s4 + $0x178] sm:$0xff] }
   0x8   :  { %104 = vmatpush.bf16.msra.mxu0 %v88_v20  ;;  %117 = vmatpush.bf16.msra.mxu1 %v91_v21  ;;  %v356_v37 = vor.u32 %v387_v32, %v353_v33  ;;  %v218_v39 = vld [vmem:[%s701_s4 + $0x1f8] sm:$0xff]  ;;  %v21_v40 = vld [vmem:[%s702_s1] sm:$0xf]  ;;  %v201_v41 = vld [vmem:[%s701_s4 + $0x170] sm:$0xff] }
   0x9   :  { %v170_v42 = vld [vmem:[%s701_s4 + $0x78] sm:$0xff]  ;;  %v217_v44 = vld [vmem:[%s701_s4 + $0x1f0] sm:$0xff]  ;;  %v200_v45 = vld [vmem:[%s701_s4 + $0x168] sm:$0xff] }
   0xa   :  { %v186_v43 = vld [vmem:[%s701_s4 + $0xf8] sm:$0xff]  ;;  %v169_v46 = vld [vmem:[%s701_s4 + $0x70] sm:$0xff]  ;;  %v216_v48 = vld [vmem:[%s701_s4 + $0x1e8] sm:$0xff] }
   0xb   :  { %131 = vmatpush.bf16.msra.mxu2 %v376_v22  ;;  %144 = vmatpush.bf16.msra.mxu3 %v380_v23  ;;  %v185_v47 = vld [vmem:[%s701_s4 + $0xf0] sm:$0xff]  ;;  %v199_v49 = vld [vmem:[%s701_s4 + $0x160] sm:$0xff]  ;;  %v168_v50 = vld [vmem:[%s701_s4 + $0x68] sm:$0xff] }
   0xc   :  { %105 = vmatpush.bf16.msra.mxu0 %v368_v26  ;;  %118 = vmatpush.bf16.msra.mxu1 %v372_v27  ;;  %v184_v51 = vld [vmem:[%s701_s4 + $0xe8] sm:$0xff]  ;;  %v215_v52 = vld [vmem:[%s701_s4 + $0x1e0] sm:$0xff]  ;;  %v198_v53 = vld [vmem:[%s701_s4 + $0x158] sm:$0xff] }
   0xd   :  { %v167_v54 = vld [vmem:[%s701_s4 + $0x60] sm:$0xff]  ;;  %v214_v56 = vld [vmem:[%s701_s4 + $0x1d8] sm:$0xff]  ;;  %v197_v57 = vld [vmem:[%s701_s4 + $0x150] sm:$0xff] }
   0xe   :  { %v183_v55 = vld [vmem:[%s701_s4 + $0xe0] sm:$0xff]  ;;  %v166_v58 = vld [vmem:[%s701_s4 + $0x58] sm:$0xff]  ;;  %v213_v60 = vld [vmem:[%s701_s4 + $0x1d0] sm:$0xff] }
   0xf   :  { %132 = vmatpush.bf16.msra.mxu2 %v360_v34  ;;  %145 = vmatpush.bf16.msra.mxu3 %v364_v35  ;;  %v182_v59 = vld [vmem:[%s701_s4 + $0xd8] sm:$0xff]  ;;  %v196_v61 = vld [vmem:[%s701_s4 + $0x148] sm:$0xff]  ;;  %v165_v62 = vld [vmem:[%s701_s4 + $0x50] sm:$0xff] }
  0x10   :  { %106 = vmatpush.bf16.msra.mxu0 %v352_v36  ;;  %119 = vmatpush.bf16.msra.mxu1 %v356_v37  ;;  %v181_v63 = vld [vmem:[%s701_s4 + $0xd0] sm:$0xff]  ;;  %v212_v0 = vld [vmem:[%s701_s4 + $0x1c8] sm:$0xff]  ;;  %v195_v1 = vld [vmem:[%s701_s4 + $0x140] sm:$0xff] }
  0x11   :  { %v164_v2 = vld [vmem:[%s701_s4 + $0x48] sm:$0xff]  ;;  %v211_v4 = vld [vmem:[%s701_s4 + $0x1c0] sm:$0xff]  ;;  %v194_v5 = vld [vmem:[%s701_s4 + $0x138] sm:$0xff] }
  0x12   :  { %383 = vmatmul.msk.bf16.vlgmr.msra.gmra.mxu2 %vm82_vm1, %v21_v40  ;;  %384 = vmatmul.msk.bf16.vlgmr.msra.gmra.mxu3 %vm82_vm1, %v21_v40  ;;  %v180_v3 = vld [vmem:[%s701_s4 + $0xc8] sm:$0xff]  ;;  %v163_v6 = vld [vmem:[%s701_s4 + $0x40] sm:$0xff]  ;;  %v210_v8 = vld [vmem:[%s701_s4 + $0x1b8] sm:$0xff] }
  0x13   :  { %259 = vmatpush.msrb.mxu2 %v202_v38  ;;  %279 = vmatpush.msrb.mxu3 %v218_v39  ;;  %v179_v7 = vld [vmem:[%s701_s4 + $0xc0] sm:$0xff]  ;;  %v193_v9 = vld [vmem:[%s701_s4 + $0x130] sm:$0xff]  ;;  %v162_v10 = vld [vmem:[%s701_s4 + $0x38] sm:$0xff] }
  0x14   :  { %381 = vmatmul.msk.bf16.vlgmr.msra.gmra.mxu0 %vm82_vm1, %v21_v40  ;;  %382 = vmatmul.msk.bf16.vlgmr.msra.gmra.mxu1 %vm82_vm1, %v21_v40  ;;  %v178_v11 = vld [vmem:[%s701_s4 + $0xb8] sm:$0xff]  ;;  %v209_v12 = vld [vmem:[%s701_s4 + $0x1b0] sm:$0xff]  ;;  %v192_v13 = vld [vmem:[%s701_s4 + $0x128] sm:$0xff] }
  0x15   :  { %260 = vmatpush.msrb.mxu2 %v201_v41  ;;  %219 = vmatpush.msrb.mxu0 %v170_v42  ;;  %v161_v14 = vld [vmem:[%s701_s4 + $0x30] sm:$0xff]  ;;  %v208_v16 = vld [vmem:[%s701_s4 + $0x1a8] sm:$0xff]  ;;  %v191_v17 = vld [vmem:[%s701_s4 + $0x120] sm:$0xff] }
  0x16   :  { %239 = vmatpush.msrb.mxu1 %v186_v43  ;;  %280 = vmatpush.msrb.mxu3 %v217_v44  ;;  %v177_v15 = vld [vmem:[%s701_s4 + $0xb0] sm:$0xff]  ;;  %v160_v18 = vld [vmem:[%s701_s4 + $0x28] sm:$0xff]  ;;  %v190_v20 = vld [vmem:[%s701_s4 + $0x118] sm:$0xff] }
  0x17   :  { %261 = vmatpush.msrb.mxu2 %v200_v45  ;;  %220 = vmatpush.msrb.mxu0 %v169_v46  ;;  %v176_v19 = vld [vmem:[%s701_s4 + $0xa8] sm:$0xff]  ;;  %v207_v21 = vld [vmem:[%s701_s4 + $0x1a0] sm:$0xff]  ;;  %v189_v24 = vld [vmem:[%s701_s4 + $0x110] sm:$0xff] }
  0x18   :  { %240 = vmatpush.msrb.mxu1 %v185_v47  ;;  %281 = vmatpush.msrb.mxu3 %v216_v48  ;;  %v159_v22 = vld [vmem:[%s701_s4 + $0x20] sm:$0xff]  ;;  %v206_v25 = vld [vmem:[%s701_s4 + $0x198] sm:$0xff]  ;;  %v188_v28 = vld [vmem:[%s701_s4 + $0x108] sm:$0xff] }
  0x19   :  { %262 = vmatpush.msrb.mxu2 %v199_v49  ;;  %221 = vmatpush.msrb.mxu0 %v168_v50  ;;  %v175_v23 = vld [vmem:[%s701_s4 + $0xa0] sm:$0xff]  ;;  %v158_v26 = vld [vmem:[%s701_s4 + $0x18] sm:$0xff]  ;;  %v205_v29 = vld [vmem:[%s701_s4 + $0x190] sm:$0xff] }
  0x1a   :  { %241 = vmatpush.msrb.mxu1 %v184_v51  ;;  %282 = vmatpush.msrb.mxu3 %v215_v52  ;;  %v174_v27 = vld [vmem:[%s701_s4 + $0x98] sm:$0xff]  ;;  %v157_v30 = vld [vmem:[%s701_s4 + $0x10] sm:$0xff]  ;;  %v187_v32 = vld [vmem:[%s701_s4 + $0x100] sm:$0xff]  ;;  %v398_v51 = vmov 0  }
  0x1b   :  { %263 = vmatpush.msrb.mxu2 %v198_v53  ;;  %222 = vmatpush.msrb.mxu0 %v167_v54  ;;  %v173_v31 = vld [vmem:[%s701_s4 + $0x90] sm:$0xff]  ;;  %v204_v33 = vld [vmem:[%s701_s4 + $0x188] sm:$0xff]  ;;  %v203_v36 = vld [vmem:[%s701_s4 + $0x180] sm:$0xff] }
  0x1c   :  { %242 = vmatpush.msrb.mxu1 %v183_v55  ;;  %283 = vmatpush.msrb.mxu3 %v214_v56  ;;  %v156_v34 = vld [vmem:[%s701_s4 + $0x8] sm:$0xff]  ;;  %v155_v37 = vld [vmem:[%s701_s4] sm:$0xff] }
  0x1d   :  { %264 = vmatpush.msrb.mxu2 %v197_v57  ;;  %223 = vmatpush.msrb.mxu0 %v166_v58  ;;  %v172_v35 = vld [vmem:[%s701_s4 + $0x88] sm:$0xff]  ;;  %v171_v38 = vld [vmem:[%s701_s4 + $0x80] sm:$0xff] }
  0x1e   :  { %243 = vmatpush.msrb.mxu1 %v182_v59  ;;  %284 = vmatpush.msrb.mxu3 %v213_v60  ;;  %v301_v52 = vld [vmem:[%s703_s3] sm:$0xff]  ;;  %v302_v53 = vld [vmem:[%s703_s3 + $0x8] sm:$0xff] }
  0x1f   :  { %265 = vmatpush.msrb.mxu2 %v196_v61  ;;  %224 = vmatpush.msrb.mxu0 %v165_v62  ;;  %v299_v61 = vld [vmem:[%s704_s2] sm:$0xff]  ;;  %v300_v62 = vld [vmem:[%s704_s2 + $0x8] sm:$0xff] }
  0x20   :  { %244 = vmatpush.msrb.mxu1 %v181_v63  ;;  %285 = vmatpush.msrb.mxu3 %v212_v0 }
  0x21   :  { %266 = vmatpush.msrb.mxu2 %v195_v1  ;;  %225 = vmatpush.msrb.mxu0 %v164_v2 }
  0x22   :  { %245 = vmatpush.msrb.mxu1 %v180_v3  ;;  %286 = vmatpush.msrb.mxu3 %v211_v4 }
  0x23   :  { %267 = vmatpush.msrb.mxu2 %v194_v5  ;;  %226 = vmatpush.msrb.mxu0 %v163_v6 }
  0x24   :  { %246 = vmatpush.msrb.mxu1 %v179_v7  ;;  %287 = vmatpush.msrb.mxu3 %v210_v8 }
  0x25   :  { %268 = vmatpush.msrb.mxu2 %v193_v9  ;;  %227 = vmatpush.msrb.mxu0 %v162_v10 }
  0x26   :  { %247 = vmatpush.msrb.mxu1 %v178_v11  ;;  %288 = vmatpush.msrb.mxu3 %v209_v12 }
  0x27   :  { %269 = vmatpush.msrb.mxu2 %v192_v13  ;;  %228 = vmatpush.msrb.mxu0 %v161_v14 }
  0x28   :  { %248 = vmatpush.msrb.mxu1 %v177_v15  ;;  %289 = vmatpush.msrb.mxu3 %v208_v16 }
  0x29   :  { %270 = vmatpush.msrb.mxu2 %v191_v17  ;;  %229 = vmatpush.msrb.mxu0 %v160_v18 }
  0x2a   :  { %249 = vmatpush.msrb.mxu1 %v176_v19  ;;  %290 = vmatpush.msrb.mxu3 %v207_v21 }
  0x2b   :  { %271 = vmatpush.msrb.mxu2 %v190_v20  ;;  %230 = vmatpush.msrb.mxu0 %v159_v22 }
  0x2c   :  { %250 = vmatpush.msrb.mxu1 %v175_v23  ;;  %291 = vmatpush.msrb.mxu3 %v206_v25 }
  0x2d   :  { %272 = vmatpush.msrb.mxu2 %v189_v24  ;;  %231 = vmatpush.msrb.mxu0 %v158_v26 }
  0x2e   :  { %251 = vmatpush.msrb.mxu1 %v174_v27  ;;  %292 = vmatpush.msrb.mxu3 %v205_v29 }
  0x2f   :  { %273 = vmatpush.msrb.mxu2 %v188_v28  ;;  %232 = vmatpush.msrb.mxu0 %v157_v30 }
  0x30   :  { %252 = vmatpush.msrb.mxu1 %v173_v31  ;;  %293 = vmatpush.msrb.mxu3 %v204_v33 }
  0x31   :  { %274 = vmatpush.msrb.mxu2 %v187_v32  ;;  %233 = vmatpush.msrb.mxu0 %v156_v34 }
  0x32   :  { %253 = vmatpush.msrb.mxu1 %v172_v35  ;;  %294 = vmatpush.msrb.mxu3 %v203_v36 }
  0x33   :  { %234 = vmatpush.msrb.mxu0 %v155_v37  ;;  %397 = vset.pattern.permute.xlu0 %v398_v51 }
  0x34   :  { %254 = vmatpush.msrb.mxu1 %v171_v38  ;;  %305 = vperm.xlu0 %397, %v301_v52  }
  0x3c   :  { %310 = vperm.xlu0 %397, %v302_v53  }
  0x91   :  { %v108_v39 = vpop.f32.mrf.mxu0  ;;  %v121_v40 = vpop.f32.mrf.mxu1 }
  0x92   :  { %v151_v41 = vmax.f32 %v108_v39, 0.0  ;;  %v152_v42 = vmax.f32 %v121_v40, 0.0 }
  0x94   :  { %235 = vmatmul.f32.vlgmr.msrb.gmra.mxu0 %v151_v41  ;;  %255 = vmatmul.f32.vlgmr.msrb.gmra.mxu1 %v152_v42 }
  0x95   :  { %v134_v43 = vpop.f32.mrf.mxu2  ;;  %v147_v44 = vpop.f32.mrf.mxu3 }
  0x96   :  { %v153_v45 = vmax.f32 %v134_v43, 0.0  ;;  %v154_v46 = vmax.f32 %v147_v44, 0.0 }
  0x98   :  { %275 = vmatmul.f32.vlgmr.msrb.gmra.mxu2 %v153_v45  ;;  %295 = vmatmul.f32.vlgmr.msrb.gmra.mxu3 %v154_v46 }
  0x99   :  { %v110_v47 = vpop.f32.mrf.mxu0  ;;  %v123_v48 = vpop.f32.mrf.mxu1 }
  0x9d   :  { %v136_v49 = vpop.f32.mrf.mxu2  ;;  %v149_v50 = vpop.f32.mrf.mxu3 }
  0xa6   :  { %v306_v63 = vpop.permute.xlu0 %305 }
  0xae   :  { %v311_v0 = vpop.permute.xlu0 %310 }
 0x111   :  { %v236_v54 = vpop.f32.mrf.mxu0  ;;  %v256_v55 = vpop.f32.mrf.mxu1 }
 0x112   :  { %v257_v56 = vadd.f32 %v256_v55, %v236_v54 }
 0x11b   :  { %v276_v57 = vpop.f32.mrf.mxu2  ;;  %v296_v58 = vpop.f32.mrf.mxu3 }
 0x11c   :  { %v277_v59 = vadd.f32 %v276_v57, %v257_v56 }
 0x11e   :  { %v297_v60 = vadd.f32 %v296_v58, %v277_v59 }
 0x120   :  { %335 = vmatpush.msra.mxu0 %v297_v60  ;;  %395 = vmatpush.msra.mxu1 %v297_v60 }
 0x121   :  { %385 = vmatmul.msk.f32.vlgmr.msra.gmra.mxu0 %vm313_vm2, %v299_v61  ;;  %386 = vmatmul.msk.f32.vlgmr.msra.gmra.mxu1 %vm313_vm2, %v300_v62 }
 0x19e   :  { %v337_v1 = vpop.f32.mrf.mxu0  ;;  %v340_v2 = vpop.f32.mrf.mxu1 }
 0x19f   :  { %v338_v3 = vadd.f32 %v337_v1, %v306_v63  ;;  %v341_v4 = vadd.f32 %v340_v2, %v311_v0 }
 0x1a1   :  { %343 = vst [vmem:[%s705_s5] sm:$0xff] %v338_v3 }
 0x1a2   :  { %344 = vst [vmem:[%s705_s5 + $0x8] sm:$0xff] %v341_v4 }

</bundles_post_ra>
